<compile_context>
chip_gen: v6e
topology: v6e:2x2x1
jax: 0.10.0
libtpu: 0.0.40
codegen_flags: <defaults>
</compile_context>

<pallas_src>
import functools

import jax
import jax.numpy as jnp
from jax.experimental import pallas as pl
from jax.experimental.pallas import tpu as pltpu


def _round_up(n, m):
    return ((n + m - 1) // m) * m


def _pad_to(a, shape):
    pads = [(0, t - s) for s, t in zip(a.shape, shape)]
    return jnp.pad(a, pads)


def _softplus(x):
    # numerically stable log(1 + exp(x)), no inf in the unselected branch
    return jnp.maximum(x, 0.0) + jnp.log1p(jnp.exp(-jnp.abs(x)))


def _make_kernel(n_hidden, out_p, use_bf16):
    """Fused MLP kernel for a fixed (static) hidden-layer count (>= 1)."""
    dot_dt = jnp.bfloat16 if use_bf16 else jnp.float32

    def kernel(*refs):
        # ref order (inputs):
        #   state, action,
        #   W0_state, W0_action, b0,
        #   (W_i, b_i) for hidden layers 1..n_hidden-1,
        #   W_heads (mean|logvar fused), b_heads,
        #   max_logvar, min_logvar
        # outputs: mean_ref, var_ref
        idx = 0
        state = refs[idx][...]; idx += 1
        action = refs[idx][...]; idx += 1
        w0s = refs[idx][...]; w0a = refs[idx + 1][...]; b0 = refs[idx + 2][...]
        idx += 3

        # fused concat: [state, action] @ W0 == state @ W0[:obs] + action @ W0[obs:]
        h = (jnp.dot(state.astype(dot_dt), w0s, preferred_element_type=jnp.float32)
             + jnp.dot(action.astype(dot_dt), w0a, preferred_element_type=jnp.float32)
             + b0)
        h = jnp.maximum(h, 0.0)  # ReLU (f32)

        for _ in range(n_hidden - 1):
            w = refs[idx][...]; b = refs[idx + 1][...]; idx += 2
            h = jnp.dot(h.astype(dot_dt), w, preferred_element_type=jnp.float32) + b
            h = jnp.maximum(h, 0.0)

        w_heads = refs[idx][...]; b_heads = refs[idx + 1][...]; idx += 2
        max_lv = refs[idx][...]; min_lv = refs[idx + 1][...]; idx += 2
        mean_ref, var_ref = refs[idx], refs[idx + 1]

        # single fused head matmul (width 2*out_p); split at a 128-lane boundary
        out = jnp.dot(h.astype(dot_dt), w_heads,
                      preferred_element_type=jnp.float32) + b_heads
        mean = out[:, :out_p]
        raw_lv = out[:, out_p:]

        lv = max_lv - _softplus(max_lv - raw_lv)
        lv = min_lv + _softplus(lv - min_lv)

        mean_ref[...] = mean            # full-lane (128-wide) stores
        var_ref[...] = jnp.exp(lv)

    return kernel


def init_params(key, obs_dim, action_dim, hidden_dims):
    """Deterministic synthetic parameter init matching BaseModel.__init__ shapes."""
    if isinstance(hidden_dims, int):
        hidden_dims = [hidden_dims]
    dims = [obs_dim + action_dim] + list(hidden_dims)
    output_dim = obs_dim + 1

    ws, bs = [], []
    for i in range(len(dims) - 1):
        key, kw, kb = jax.random.split(key, 3)
        ws.append(0.1 * jax.random.normal(kw, (dims[i], dims[i + 1]), jnp.float32))
        bs.append(0.1 * jax.random.normal(kb, (1, dims[i + 1]), jnp.float32))

    key, kw, kb = jax.random.split(key, 3)
    w_final = 0.1 * jax.random.normal(kw, (dims[-1], output_dim * 2), jnp.float32)
    b_final = 0.1 * jax.random.normal(kb, (1, output_dim * 2), jnp.float32)

    max_logvar = jnp.ones((1, output_dim), jnp.float32) / 2.0
    min_logvar = -jnp.ones((1, output_dim), jnp.float32) * 10.0

    return {
        "ws": ws,
        "bs": bs,
        "w_final": w_final,
        "b_final": b_final,
        "max_logvar": max_logvar,
        "min_logvar": min_logvar,
        "output_dim": output_dim,
    }


@functools.partial(jax.jit, static_argnames=("output_dim", "use_bf16"))
def _forward_impl(state, action, ws, bs, w_final, b_final, max_lv, min_lv,
                  output_dim, use_bf16):
    f32 = jnp.float32
    w_dt = jnp.bfloat16 if use_bf16 else jnp.float32

    B, obs_dim = state.shape
    act_dim = action.shape[1]
    n_hidden = len(ws)

    # lane-dense padded widths
    hidden_p = [_round_up(int(w.shape[1]), 128) for w in ws]
    out_p = _round_up(output_dim, 128)

    # batch tiling: tile rows (mult of 8), pad batch to a whole number of tiles
    tb = min(512, _round_up(B, 8))
    b_pad = _round_up(B, tb)

    state_p = _pad_to(state.astype(f32), (b_pad, obs_dim))
    action_p = _pad_to(action.astype(f32), (b_pad, act_dim))

    flat = []
    in_specs = [
        pl.BlockSpec((tb, obs_dim), lambda i: (i, 0)),
        pl.BlockSpec((tb, act_dim), lambda i: (i, 0)),
    ]

    def add_full(arr):
        # weights/biases: single full block, resident across the batch grid
        flat.append(arr)
        in_specs.append(pl.BlockSpec(arr.shape, lambda i: (0, 0)))

    # layer 0: split W0 so the concat can be fused into two matmuls
    w0 = ws[0].astype(f32)
    add_full(_pad_to(w0[:obs_dim], (obs_dim, hidden_p[0])).astype(w_dt))
    add_full(_pad_to(w0[obs_dim:], (act_dim, hidden_p[0])).astype(w_dt))
    add_full(_pad_to(bs[0].astype(f32), (1, hidden_p[0])))

    for li in range(1, n_hidden):
        add_full(_pad_to(ws[li].astype(f32),
                         (hidden_p[li - 1], hidden_p[li])).astype(w_dt))
        add_full(_pad_to(bs[li].astype(f32), (1, hidden_p[li])))

    # final layer: mean / logvar heads fused into one lane-padded matmul
    # (each head zero-padded to out_p lanes; split in-kernel at lane 128k)
    wf = w_final.astype(f32)
    bf = b_final.astype(f32)
    w_heads = jnp.concatenate(
        [_pad_to(wf[:, :output_dim], (hidden_p[-1], out_p)),
         _pad_to(wf[:, output_dim:], (hidden_p[-1], out_p))], axis=1)
    b_heads = jnp.concatenate(
        [_pad_to(bf[:, :output_dim], (1, out_p)),
         _pad_to(bf[:, output_dim:], (1, out_p))], axis=1)
    add_full(w_heads.astype(w_dt))
    add_full(b_heads)
    add_full(_pad_to(max_lv.astype(f32), (1, out_p)))
    add_full(_pad_to(min_lv.astype(f32), (1, out_p)))

    out_spec = pl.BlockSpec((tb, out_p), lambda i: (i, 0))

    # advisory cost estimate
    mm_flops = 2 * b_pad * (obs_dim + act_dim) * hidden_p[0]
    for li in range(1, n_hidden):
        mm_flops += 2 * b_pad * hidden_p[li - 1] * hidden_p[li]
    mm_flops += 2 * b_pad * hidden_p[-1] * (2 * out_p)
    total_bytes = (state_p.size * state_p.dtype.itemsize
                   + action_p.size * action_p.dtype.itemsize
                   + sum(a.size * a.dtype.itemsize for a in flat)
                   + 2 * b_pad * out_p * 4)

    mean_p, var_p = pl.pallas_call(
        _make_kernel(n_hidden, out_p, use_bf16),
        grid=(b_pad // tb,),
        in_specs=in_specs,
        out_specs=(out_spec, out_spec),
        out_shape=(
            jax.ShapeDtypeStruct((b_pad, out_p), jnp.float32),
            jax.ShapeDtypeStruct((b_pad, out_p), jnp.float32),
        ),
        compiler_params=pltpu.CompilerParams(
            dimension_semantics=("parallel",),     # megacore split on v7x
            vmem_limit_bytes=32 * 1024 * 1024,
        ),
        cost_estimate=pl.CostEstimate(
            flops=int(mm_flops),
            transcendentals=int(5 * b_pad * out_p),
            bytes_accessed=int(total_bytes),
        ),
    )(state_p, action_p, *flat)

    # strip batch / lane padding in the wrapper (cheap XLA slice)
    return mean_p[:B, :output_dim], var_p[:B, :output_dim]


def base_model_forward(state, action, params, use_bf16=False):
    """BaseModel.forward: returns (mean, var)."""
    # TODO(synk): for ensembles (MBPO/PETS) add a leading ensemble grid axis so
    # all members run in a single pallas_call instead of one call per member.
    return _forward_impl(
        state, action,
        tuple(params["ws"]), tuple(params["bs"]),
        params["w_final"], params["b_final"],
        params["max_logvar"], params["min_logvar"],
        output_dim=params["output_dim"], use_bf16=use_bf16)


def base_model_forward_ref(state, action, params):
    """Pure-JAX reference for correctness checks."""
    h = jnp.concatenate([state, action], axis=1).astype(jnp.float32)
    for w, b in zip(params["ws"], params["bs"]):
        h = jnp.maximum(h @ w + b, 0.0)
    out = h @ params["w_final"] + params["b_final"]
    D = params["output_dim"]
    mean = out[:, :D]
    logvar = params["max_logvar"] - jax.nn.softplus(params["max_logvar"] - out[:, D:])
    logvar = params["min_logvar"] + jax.nn.softplus(logvar - params["min_logvar"])
    return mean, jnp.exp(logvar)


if __name__ == "__main__":
    obs_dim, action_dim = 16, 8
    hidden_dims = [32, 32]
    batch = 8

    key = jax.random.PRNGKey(0)
    key, ks, ka, kp = jax.random.split(key, 4)
    state = jax.random.normal(ks, (batch, obs_dim), jnp.float32)
    action = jax.random.normal(ka, (batch, action_dim), jnp.float32)
    params = init_params(kp, obs_dim, action_dim, hidden_dims)

    mean_ref, var_ref = base_model_forward_ref(state, action, params)

    # f32 MXU path (exact to 1e-4)
    mean, var = base_model_forward(state, action, params)
    jax.block_until_ready((mean, var))
    assert mean.shape == (batch, obs_dim + 1) and var.shape == (batch, obs_dim + 1)
    assert jnp.allclose(mean, mean_ref, atol=1e-4, rtol=1e-4)
    assert jnp.allclose(var, var_ref, atol=1e-4, rtol=1e-4)

    # bf16 MXU-operand path (v6e/v7x), f32 accumulation + f32 elementwise
    mean_bf, var_bf = base_model_forward(state, action, params, use_bf16=True)
    jax.block_until_ready((mean_bf, var_bf))
    assert jnp.allclose(mean_bf, mean_ref, atol=0.1, rtol=0.1)
    assert jnp.allclose(var_bf, var_ref, atol=0.1, rtol=0.1)

    # larger batch exercises the multi-tile "parallel" grid path
    kb1, kb2 = jax.random.split(key, 2)
    state_l = jax.random.normal(kb1, (1000, obs_dim), jnp.float32)
    action_l = jax.random.normal(kb2, (1000, action_dim), jnp.float32)
    mean_l, var_l = base_model_forward(state_l, action_l, params)
    mean_lr, var_lr = base_model_forward_ref(state_l, action_l, params)
    jax.block_until_ready((mean_l, var_l))
    assert jnp.allclose(mean_l, mean_lr, atol=1e-4, rtol=1e-4)
    assert jnp.allclose(var_l, var_lr, atol=1e-4, rtol=1e-4)

    print("KERNEL_OK")
</pallas_src>

<mosaic_0001>
module attributes {stable_mosaic.version = 11 : i64} {
  func.func @kernel(%arg0: i32, %arg1: memref<8x16xf32, #tpu.memory_space<vmem>>, %arg2: memref<8x8xf32, #tpu.memory_space<vmem>>, %arg3: memref<16x128xf32, #tpu.memory_space<vmem>>, %arg4: memref<8x128xf32, #tpu.memory_space<vmem>>, %arg5: memref<1x128xf32, #tpu.memory_space<vmem>>, %arg6: memref<128x128xf32, #tpu.memory_space<vmem>>, %arg7: memref<1x128xf32, #tpu.memory_space<vmem>>, %arg8: memref<128x256xf32, #tpu.memory_space<vmem>>, %arg9: memref<1x256xf32, #tpu.memory_space<vmem>>, %arg10: memref<1x128xf32, #tpu.memory_space<vmem>>, %arg11: memref<1x128xf32, #tpu.memory_space<vmem>>, %arg12: memref<8x128xf32, #tpu.memory_space<vmem>>, %arg13: memref<8x128xf32, #tpu.memory_space<vmem>>) attributes {dimension_semantics = [#tpu.dimension_semantics<parallel>], iteration_bounds = array<i64: 1>, scalar_prefetch = 0 : i64, scratch_operands = 0 : i64, tpu.core_type = #tpu.core_type<tc>, window_params = [{transform_indices = @transform_0, window_bounds = array<i64: 8, 16>}, {transform_indices = @transform_1, window_bounds = array<i64: 8, 8>}, {pipeline_mode = #tpu.pipeline_mode<synchronous>, transform_indices = @transform_2, window_bounds = array<i64: 16, 128>}, {pipeline_mode = #tpu.pipeline_mode<synchronous>, transform_indices = @transform_3, window_bounds = array<i64: 8, 128>}, {pipeline_mode = #tpu.pipeline_mode<synchronous>, transform_indices = @transform_4, window_bounds = array<i64: 1, 128>}, {pipeline_mode = #tpu.pipeline_mode<synchronous>, transform_indices = @transform_5, window_bounds = array<i64: 128, 128>}, {pipeline_mode = #tpu.pipeline_mode<synchronous>, transform_indices = @transform_6, window_bounds = array<i64: 1, 128>}, {pipeline_mode = #tpu.pipeline_mode<synchronous>, transform_indices = @transform_7, window_bounds = array<i64: 128, 256>}, {pipeline_mode = #tpu.pipeline_mode<synchronous>, transform_indices = @transform_8, window_bounds = array<i64: 1, 256>}, {pipeline_mode = #tpu.pipeline_mode<synchronous>, transform_indices = @transform_9, window_bounds = array<i64: 1, 128>}, {pipeline_mode = #tpu.pipeline_mode<synchronous>, transform_indices = @transform_10, window_bounds = array<i64: 1, 128>}, {transform_indices = @transform_11, window_bounds = array<i64: 8, 128>}, {transform_indices = @transform_12, window_bounds = array<i64: 8, 128>}]} {
    %c0 = arith.constant 0 : index
    %c0_0 = arith.constant 0 : index
    %0 = vector.load %arg1[%c0, %c0_0] : memref<8x16xf32, #tpu.memory_space<vmem>>, vector<8x16xf32>
    %c0_1 = arith.constant 0 : index
    %c0_2 = arith.constant 0 : index
    %1 = vector.load %arg2[%c0_1, %c0_2] : memref<8x8xf32, #tpu.memory_space<vmem>>, vector<8x8xf32>
    %c0_3 = arith.constant 0 : index
    %c0_4 = arith.constant 0 : index
    %2 = vector.load %arg3[%c0_3, %c0_4] : memref<16x128xf32, #tpu.memory_space<vmem>>, vector<16x128xf32>
    %c0_5 = arith.constant 0 : index
    %c0_6 = arith.constant 0 : index
    %3 = vector.load %arg4[%c0_5, %c0_6] : memref<8x128xf32, #tpu.memory_space<vmem>>, vector<8x128xf32>
    %c0_7 = arith.constant 0 : index
    %c0_8 = arith.constant 0 : index
    %4 = vector.load %arg5[%c0_7, %c0_8] : memref<1x128xf32, #tpu.memory_space<vmem>>, vector<1x128xf32>
    %cst = arith.constant dense<0.000000e+00> : vector<8x128xf32>
    %5 = tpu.matmul %0, %2, %cst {dimension_numbers = #tpu.dot_dimension_numbers<[1], [0], [0], [1], [0, 0, 1, 1], [], []>} : vector<8x16xf32>, vector<16x128xf32>, vector<8x128xf32> -> vector<8x128xf32>
    %cst_9 = arith.constant dense<0.000000e+00> : vector<8x128xf32>
    %6 = tpu.matmul %1, %3, %cst_9 {dimension_numbers = #tpu.dot_dimension_numbers<[1], [0], [0], [1], [0, 0, 1, 1], [], []>} : vector<8x8xf32>, vector<8x128xf32>, vector<8x128xf32> -> vector<8x128xf32>
    %7 = arith.addf %5, %6 : vector<8x128xf32>
    %8 = vector.broadcast %4 : vector<1x128xf32> to vector<8x128xf32>
    %9 = arith.addf %7, %8 : vector<8x128xf32>
    %cst_10 = arith.constant 0.000000e+00 : f32
    %10 = vector.broadcast %cst_10 : f32 to vector<8x128xf32>
    %11 = arith.maximumf %9, %10 : vector<8x128xf32>
    %c0_11 = arith.constant 0 : index
    %c0_12 = arith.constant 0 : index
    %12 = vector.load %arg6[%c0_11, %c0_12] : memref<128x128xf32, #tpu.memory_space<vmem>>, vector<128x128xf32>
    %c0_13 = arith.constant 0 : index
    %c0_14 = arith.constant 0 : index
    %13 = vector.load %arg7[%c0_13, %c0_14] : memref<1x128xf32, #tpu.memory_space<vmem>>, vector<1x128xf32>
    %cst_15 = arith.constant dense<0.000000e+00> : vector<8x128xf32>
    %14 = tpu.matmul %11, %12, %cst_15 {dimension_numbers = #tpu.dot_dimension_numbers<[1], [0], [0], [1], [0, 0, 1, 1], [], []>} : vector<8x128xf32>, vector<128x128xf32>, vector<8x128xf32> -> vector<8x128xf32>
    %15 = vector.broadcast %13 : vector<1x128xf32> to vector<8x128xf32>
    %16 = arith.addf %14, %15 : vector<8x128xf32>
    %cst_16 = arith.constant 0.000000e+00 : f32
    %17 = vector.broadcast %cst_16 : f32 to vector<8x128xf32>
    %18 = arith.maximumf %16, %17 : vector<8x128xf32>
    %c0_17 = arith.constant 0 : index
    %c0_18 = arith.constant 0 : index
    %19 = vector.load %arg8[%c0_17, %c0_18] : memref<128x256xf32, #tpu.memory_space<vmem>>, vector<128x256xf32>
    %c0_19 = arith.constant 0 : index
    %c0_20 = arith.constant 0 : index
    %20 = vector.load %arg9[%c0_19, %c0_20] : memref<1x256xf32, #tpu.memory_space<vmem>>, vector<1x256xf32>
    %c0_21 = arith.constant 0 : index
    %c0_22 = arith.constant 0 : index
    %21 = vector.load %arg10[%c0_21, %c0_22] : memref<1x128xf32, #tpu.memory_space<vmem>>, vector<1x128xf32>
    %c0_23 = arith.constant 0 : index
    %c0_24 = arith.constant 0 : index
    %22 = vector.load %arg11[%c0_23, %c0_24] : memref<1x128xf32, #tpu.memory_space<vmem>>, vector<1x128xf32>
    %cst_25 = arith.constant dense<0.000000e+00> : vector<8x256xf32>
    %23 = tpu.matmul %18, %19, %cst_25 {dimension_numbers = #tpu.dot_dimension_numbers<[1], [0], [0], [1], [0, 0, 1, 1], [], []>} : vector<8x128xf32>, vector<128x256xf32>, vector<8x256xf32> -> vector<8x256xf32>
    %24 = vector.broadcast %20 : vector<1x256xf32> to vector<8x256xf32>
    %25 = arith.addf %23, %24 : vector<8x256xf32>
    %26 = vector.extract_strided_slice %25 {offsets = [0, 0], sizes = [8, 128], strides = [1, 1]} : vector<8x256xf32> to vector<8x128xf32>
    %27 = vector.extract_strided_slice %25 {offsets = [0, 128], sizes = [8, 128], strides = [1, 1]} : vector<8x256xf32> to vector<8x128xf32>
    %28 = vector.broadcast %21 : vector<1x128xf32> to vector<8x128xf32>
    %29 = arith.subf %28, %27 : vector<8x128xf32>
    %cst_26 = arith.constant 0.000000e+00 : f32
    %30 = vector.broadcast %cst_26 : f32 to vector<8x128xf32>
    %31 = arith.maximumf %29, %30 : vector<8x128xf32>
    %32 = math.absf %29 : vector<8x128xf32>
    %cst_27 = arith.constant 0.000000e+00 : f32
    %33 = vector.broadcast %cst_27 : f32 to vector<8x128xf32>
    %34 = arith.subf %33, %32 : vector<8x128xf32>
    %35 = math.exp %34 : vector<8x128xf32>
    %36 = math.log1p %35 : vector<8x128xf32>
    %37 = arith.addf %31, %36 : vector<8x128xf32>
    %38 = vector.broadcast %21 : vector<1x128xf32> to vector<8x128xf32>
    %39 = arith.subf %38, %37 : vector<8x128xf32>
    %40 = vector.broadcast %22 : vector<1x128xf32> to vector<8x128xf32>
    %41 = arith.subf %39, %40 : vector<8x128xf32>
    %cst_28 = arith.constant 0.000000e+00 : f32
    %42 = vector.broadcast %cst_28 : f32 to vector<8x128xf32>
    %43 = arith.maximumf %41, %42 : vector<8x128xf32>
    %44 = math.absf %41 : vector<8x128xf32>
    %cst_29 = arith.constant 0.000000e+00 : f32
    %45 = vector.broadcast %cst_29 : f32 to vector<8x128xf32>
    %46 = arith.subf %45, %44 : vector<8x128xf32>
    %47 = math.exp %46 : vector<8x128xf32>
    %48 = math.log1p %47 : vector<8x128xf32>
    %49 = arith.addf %43, %48 : vector<8x128xf32>
    %50 = vector.broadcast %22 : vector<1x128xf32> to vector<8x128xf32>
    %51 = arith.addf %50, %49 : vector<8x128xf32>
    %c0_30 = arith.constant 0 : index
    %c0_31 = arith.constant 0 : index
    %52 = vector.load %arg12[%c0_30, %c0_31] : memref<8x128xf32, #tpu.memory_space<vmem>>, vector<8x128xf32>
    tpu.vector_store %arg12[%c0_30, %c0_31], %26 {strides = array<i32>} : memref<8x128xf32, #tpu.memory_space<vmem>>, vector<8x128xf32>,
    %53 = math.exp %51 : vector<8x128xf32>
    %c0_32 = arith.constant 0 : index
    %c0_33 = arith.constant 0 : index
    %54 = vector.load %arg13[%c0_32, %c0_33] : memref<8x128xf32, #tpu.memory_space<vmem>>, vector<8x128xf32>
    tpu.vector_store %arg13[%c0_32, %c0_33], %53 {strides = array<i32>} : memref<8x128xf32, #tpu.memory_space<vmem>>, vector<8x128xf32>,
    return
  }
  func.func @transform_0(%arg0: i32) -> (i32, i32) {
    %c0_i32 = arith.constant 0 : i32
    %c0_i32_0 = arith.constant 0 : i32
    return %arg0, %c0_i32 : i32, i32
  }
  func.func @transform_1(%arg0: i32) -> (i32, i32) {
    %c0_i32 = arith.constant 0 : i32
    %c0_i32_0 = arith.constant 0 : i32
    return %arg0, %c0_i32 : i32, i32
  }
  func.func @transform_2(%arg0: i32) -> (i32, i32) {
    %c0_i32 = arith.constant 0 : i32
    %c0_i32_0 = arith.constant 0 : i32
    %c0_i32_1 = arith.constant 0 : i32
    return %c0_i32, %c0_i32_0 : i32, i32
  }
  func.func @transform_3(%arg0: i32) -> (i32, i32) {
    %c0_i32 = arith.constant 0 : i32
    %c0_i32_0 = arith.constant 0 : i32
    %c0_i32_1 = arith.constant 0 : i32
    return %c0_i32, %c0_i32_0 : i32, i32
  }
  func.func @transform_4(%arg0: i32) -> (i32, i32) {
    %c0_i32 = arith.constant 0 : i32
    %c0_i32_0 = arith.constant 0 : i32
    %c0_i32_1 = arith.constant 0 : i32
    return %c0_i32, %c0_i32_0 : i32, i32
  }
  func.func @transform_5(%arg0: i32) -> (i32, i32) {
    %c0_i32 = arith.constant 0 : i32
    %c0_i32_0 = arith.constant 0 : i32
    %c0_i32_1 = arith.constant 0 : i32
    return %c0_i32, %c0_i32_0 : i32, i32
  }
  func.func @transform_6(%arg0: i32) -> (i32, i32) {
    %c0_i32 = arith.constant 0 : i32
    %c0_i32_0 = arith.constant 0 : i32
    %c0_i32_1 = arith.constant 0 : i32
    return %c0_i32, %c0_i32_0 : i32, i32
  }
  func.func @transform_7(%arg0: i32) -> (i32, i32) {
    %c0_i32 = arith.constant 0 : i32
    %c0_i32_0 = arith.constant 0 : i32
    %c0_i32_1 = arith.constant 0 : i32
    return %c0_i32, %c0_i32_0 : i32, i32
  }
  func.func @transform_8(%arg0: i32) -> (i32, i32) {
    %c0_i32 = arith.constant 0 : i32
    %c0_i32_0 = arith.constant 0 : i32
    %c0_i32_1 = arith.constant 0 : i32
    return %c0_i32, %c0_i32_0 : i32, i32
  }
  func.func @transform_9(%arg0: i32) -> (i32, i32) {
    %c0_i32 = arith.constant 0 : i32
    %c0_i32_0 = arith.constant 0 : i32
    %c0_i32_1 = arith.constant 0 : i32
    return %c0_i32, %c0_i32_0 : i32, i32
  }
  func.func @transform_10(%arg0: i32) -> (i32, i32) {
    %c0_i32 = arith.constant 0 : i32
    %c0_i32_0 = arith.constant 0 : i32
    %c0_i32_1 = arith.constant 0 : i32
    return %c0_i32, %c0_i32_0 : i32, i32
  }
  func.func @transform_11(%arg0: i32) -> (i32, i32) {
    %c0_i32 = arith.constant 0 : i32
    %c0_i32_0 = arith.constant 0 : i32
    return %arg0, %c0_i32 : i32, i32
  }
  func.func @transform_12(%arg0: i32) -> (i32, i32) {
    %c0_i32 = arith.constant 0 : i32
    %c0_i32_0 = arith.constant 0 : i32
    return %arg0, %c0_i32 : i32, i32
  }
}

</mosaic_0001>

<bundles_post_ra>
// kernel: _forward_impl.1
= control target key start
LH: loop header
LB: loop body
LE: loop exit
PB: predicated region body
PF: predicated region fallthrough
CT: control target
= control target key end

     0   :  { %18 = vsyncpa [#allocation3], 0  ;;  %vm48_vm0 = vcmask 64512   ;;  %v626_v3 = vmov 0.0   ;;  %vm627_vm1 = vmmov 0   ;;  %vm122_vm2 = vcmask 130048   ;;  %s878_s0 = inlined_call_operand.vmem [shape: f32[8,16], index: 0, kind: input, shape index: {}]   ;;  %s879_s1 = inlined_call_operand.vmem [shape: f32[8,8], index: 1, kind: input, shape index: {}]   ;;  %s880_s2 = inlined_call_operand.vmem [shape: f32[16,128], index: 2, kind: input, shape index: {}]   ;;  %s881_s3 = inlined_call_operand.vmem [shape: f32[8,128], index: 3, kind: input, shape index: {}]   ;;  %s882_s4 = inlined_call_operand.vmem [shape: f32[1,128], index: 4, kind: input, shape index: {}]   ;;  %s883_s5 = inlined_call_operand.vmem [shape: f32[128,128], index: 5, kind: input, shape index: {}]   ;;  %s884_s6 = inlined_call_operand.vmem [shape: f32[1,128], index: 6, kind: input, shape index: {}]   ;;  %s885_s7 = inlined_call_operand.vmem [shape: f32[128,256], index: 7, kind: input, shape index: {}]   ;;  %s886_s8 = inlined_call_operand.vmem [shape: f32[1,256], index: 8, kind: input, shape index: {}]   ;;  %s887_s9 = inlined_call_operand.vmem [shape: f32[1,128], index: 9, kind: input, shape index: {}]   ;;  %s888_s10 = inlined_call_operand.vmem [shape: f32[1,128], index: 10, kind: input, shape index: {}]   ;;  %s889_s11 = inlined_call_operand.hbm [shape: f32[8,128], index: 11, kind: output, shape index: {0}]   ;;  %s890_s12 = inlined_call_operand.hbm [shape: f32[8,128], index: 12, kind: output, shape index: {1}]  }
   0x1   :  { %v46_v0 = vld [vmem:[%s881_s3] sm:$0xff]  ;;  %v45_v1 = vld [vmem:[%s880_s2 + $0x8] sm:$0xff]  ;;  %521 = vmatprep.subr.mxu0 %v626_v3  ;;  %526 = vmatprep.subr.mxu1 %v626_v3  ;;  %v219_v6 = vld [vmem:[%s883_s5 + $0x78] sm:$0xff] }
   0x2   :  { %v43_v2 = vld [vmem:[%s879_s1] sm:$0xff]  ;;  %522 = vmatpush3.msra.mxu0 %v46_v0  ;;  %523 = vmatprep.mubr.msk.f32.mxu0 %vm627_vm1, %v626_v3  ;;  %v218_v7 = vld [vmem:[%s883_s5 + $0x70] sm:$0xff] }
   0x3   :  { %v44_v4 = vld [vmem:[%s880_s2] sm:$0xff]  ;;  %527 = vmatpush3.msra.mxu1 %v45_v1  ;;  %524 = vmatmul.mubr.msk.f32.vlgmr.msra.gmra.mxu0 %vm48_vm0, %v43_v2 }
   0x4   :  { %v42_v5 = vld [vmem:[%s878_s0] sm:$0xff]  ;;  %528 = vmatprep.subr.mxu1 %v626_v3  ;;  %530 = vmatprep.mubr.msk.f32.mxu1 %vm627_vm1, %v626_v3 }
   0x5   :  { %529 = vmatpush3.msra.mxu1 %v44_v4  ;;  %533 = vmatprep.subr.mxu0 %v626_v3 }
   0x6   :  { %19 = vsyncpa [#allocation5], 0  ;;  %531 = vmatmul.mubr.msk.f32.vlgmr.msra.gmra.mxu1 %vm122_vm2, %v42_v5  ;;  %534 = vmatpush3.msra.mxu0 %v219_v6  ;;  %v217_v8 = vld [vmem:[%s883_s5 + $0x68] sm:$0xff]  ;;  %v216_v9 = vld [vmem:[%s883_s5 + $0x60] sm:$0xff] }
   0x7   :  { %535 = vmatprep.subr.mxu0 %v626_v3  ;;  %565 = vmatprep.mubr.msk.f32.mxu0 %vm627_vm1, %v626_v3  ;;  %v215_v10 = vld [vmem:[%s883_s5 + $0x58] sm:$0xff]  ;;  %v214_v11 = vld [vmem:[%s883_s5 + $0x50] sm:$0xff]  ;;  %v213_v12 = vld [vmem:[%s883_s5 + $0x48] sm:$0xff] }
   0x8   :  { %536 = vmatpush3.msra.mxu0 %v218_v7  ;;  %408 = vmatprep.mubr.f32.mxu1 %v626_v3  ;;  %v212_v13 = vld [vmem:[%s883_s5 + $0x40] sm:$0xff]  ;;  %v211_v14 = vld [vmem:[%s883_s5 + $0x38] sm:$0xff]  ;;  %v210_v15 = vld [vmem:[%s883_s5 + $0x30] sm:$0xff] }
   0x9   :  { %537 = vmatprep.subr.mxu0 %v626_v3  ;;  %v209_v16 = vld [vmem:[%s883_s5 + $0x28] sm:$0xff]  ;;  %v208_v17 = vld [vmem:[%s883_s5 + $0x20] sm:$0xff]  ;;  %v207_v18 = vld [vmem:[%s883_s5 + $0x18] sm:$0xff] }
   0xa   :  { %538 = vmatpush3.msra.mxu0 %v217_v8  ;;  %v206_v19 = vld [vmem:[%s883_s5 + $0x10] sm:$0xff]  ;;  %v205_v20 = vld [vmem:[%s883_s5 + $0x8] sm:$0xff]  ;;  %v204_v21 = vld [vmem:[%s883_s5] sm:$0xff] }
   0xb   :  { %539 = vmatprep.subr.mxu0 %v626_v3  ;;  %v329_v22 = vld [vmem:[%s885_s7 + $0xf8] sm:$0xff]  ;;  %v328_v23 = vld [vmem:[%s885_s7 + $0xf0] sm:$0xff]  ;;  %v327_v24 = vld [vmem:[%s885_s7 + $0xe8] sm:$0xff] }
   0xc   :  { %540 = vmatpush3.msra.mxu0 %v216_v9  ;;  %344 = vmatprep.subr.mxu1 %v329_v22  ;;  %v326_v25 = vld [vmem:[%s885_s7 + $0xe0] sm:$0xff]  ;;  %v325_v26 = vld [vmem:[%s885_s7 + $0xd8] sm:$0xff]  ;;  %v324_v27 = vld [vmem:[%s885_s7 + $0xd0] sm:$0xff] }
   0xd   :  { %541 = vmatprep.subr.mxu0 %v626_v3  ;;  %345 = vmatpush1.msra.mxu1 %v328_v23  ;;  %v323_v28 = vld [vmem:[%s885_s7 + $0xc8] sm:$0xff]  ;;  %v322_v29 = vld [vmem:[%s885_s7 + $0xc0] sm:$0xff]  ;;  %v321_v30 = vld [vmem:[%s885_s7 + $0xb8] sm:$0xff] }
   0xe   :  { %542 = vmatpush3.msra.mxu0 %v215_v10  ;;  %346 = vmatprep.subr.mxu1 %v327_v24  ;;  %v320_v31 = vld [vmem:[%s885_s7 + $0xb0] sm:$0xff]  ;;  %v319_v32 = vld [vmem:[%s885_s7 + $0xa8] sm:$0xff]  ;;  %v318_v33 = vld [vmem:[%s885_s7 + $0xa0] sm:$0xff] }
   0xf   :  { %543 = vmatprep.subr.mxu0 %v626_v3  ;;  %347 = vmatpush1.msra.mxu1 %v326_v25  ;;  %v317_v34 = vld [vmem:[%s885_s7 + $0x98] sm:$0xff]  ;;  %v316_v35 = vld [vmem:[%s885_s7 + $0x90] sm:$0xff]  ;;  %v315_v36 = vld [vmem:[%s885_s7 + $0x88] sm:$0xff] }
  0x10   :  { %544 = vmatpush3.msra.mxu0 %v214_v11  ;;  %348 = vmatprep.subr.mxu1 %v325_v26  ;;  %v314_v37 = vld [vmem:[%s885_s7 + $0x80] sm:$0xff]  ;;  %v313_v38 = vld [vmem:[%s885_s7 + $0x78] sm:$0xff]  ;;  %v312_v39 = vld [vmem:[%s885_s7 + $0x70] sm:$0xff] }
  0x11   :  { %545 = vmatprep.subr.mxu0 %v626_v3  ;;  %349 = vmatpush1.msra.mxu1 %v324_v27  ;;  %v311_v40 = vld [vmem:[%s885_s7 + $0x68] sm:$0xff]  ;;  %v310_v41 = vld [vmem:[%s885_s7 + $0x60] sm:$0xff]  ;;  %v309_v42 = vld [vmem:[%s885_s7 + $0x58] sm:$0xff] }
  0x12   :  { %546 = vmatpush3.msra.mxu0 %v213_v12  ;;  %350 = vmatprep.subr.mxu1 %v323_v28  ;;  %v308_v43 = vld [vmem:[%s885_s7 + $0x50] sm:$0xff]  ;;  %v307_v44 = vld [vmem:[%s885_s7 + $0x48] sm:$0xff]  ;;  %v306_v45 = vld [vmem:[%s885_s7 + $0x40] sm:$0xff] }
  0x13   :  { %547 = vmatprep.subr.mxu0 %v626_v3  ;;  %351 = vmatpush1.msra.mxu1 %v322_v29  ;;  %v305_v46 = vld [vmem:[%s885_s7 + $0x38] sm:$0xff]  ;;  %v304_v47 = vld [vmem:[%s885_s7 + $0x30] sm:$0xff]  ;;  %v303_v48 = vld [vmem:[%s885_s7 + $0x28] sm:$0xff] }
  0x14   :  { %548 = vmatpush3.msra.mxu0 %v212_v13  ;;  %352 = vmatprep.subr.mxu1 %v321_v30  ;;  %v495_v51 = vld [vmem:[%s882_s4] ss:$0 sm:$0xff]  ;;  %v301_v58 = vld [vmem:[%s885_s7 + $0x18] sm:$0xff]  ;;  %v300_v59 = vld [vmem:[%s885_s7 + $0x10] sm:$0xff] }
  0x15   :  { %549 = vmatprep.subr.mxu0 %v626_v3  ;;  %353 = vmatpush1.msra.mxu1 %v320_v31  ;;  %v302_v57 = vld [vmem:[%s885_s7 + $0x20] sm:$0xff]  ;;  %v299_v60 = vld [vmem:[%s885_s7 + $0x8] sm:$0xff] }
  0x16   :  { %550 = vmatpush3.msra.mxu0 %v211_v14  ;;  %354 = vmatprep.subr.mxu1 %v319_v32  ;;  %v298_v61 = vld [vmem:[%s885_s7] sm:$0xff]  ;;  %s628_s7 = smov [#allocation2]  }
  0x17   :  { %551 = vmatprep.subr.mxu0 %v626_v3  ;;  %355 = vmatpush1.msra.mxu1 %v318_v33  ;;  %v496_v62 = vld [vmem:[%s884_s6] ss:$0 sm:$0xff]  ;;  %s471_s19 = sshll.u32 %s628_s7, 4  ;;  %s472_s19 = int_to_ptr.vmem [resolvable:$true] %s471_s19 }
  0x18   :  { %552 = vmatpush3.msra.mxu0 %v210_v15  ;;  %356 = vmatprep.subr.mxu1 %v317_v34  ;;  %v330_v6 = vld [vmem:[%s886_s8] sm:$0x3]  ;;  %s582_s21 = scalar_lea.vmem %s472_s19, 128  ;;  %p587_p1 = scmp.lt.s32.totalorder %s472_s19, %s472_s19 }
  0x19   :  { %553 = vmatprep.subr.mxu0 %v626_v3  ;;  %357 = vmatpush1.msra.mxu1 %v316_v35  ;;  %v497_v12 = vld [vmem:[%s887_s9] ss:$0 sm:$0xff]  ;;  %p583_p0 = scmp.ne.s32.totalorder %s472_s19, %s582_s21  ;;  %p588_p2 = scmp.lt.s32.totalorder %s582_s21, %s582_s21 }
  0x1a   :  { %554 = vmatpush3.msra.mxu0 %v209_v16  ;;  %358 = vmatprep.subr.mxu1 %v315_v36 }
  0x1b   :  { %555 = vmatprep.subr.mxu0 %v626_v3  ;;  %359 = vmatpush1.msra.mxu1 %v314_v37  ;;  %p589_p3 = por %p588_p2, %p587_p1 }
  0x1c   :  { %556 = vmatpush3.msra.mxu0 %v208_v17  ;;  %360 = vmatprep.subr.mxu1 %v313_v38 }
  0x1d   :  { %557 = vmatprep.subr.mxu0 %v626_v3  ;;  %361 = vmatpush1.msra.mxu1 %v312_v39  ;;  %p590_p4 = pnand %p589_p3, %p583_p0 }
  0x1e   :  { %558 = vmatpush3.msra.mxu0 %v207_v18  ;;  %362 = vmatprep.subr.mxu1 %v311_v40 }
  0x1f   :  { %559 = vmatprep.subr.mxu0 %v626_v3  ;;  %363 = vmatpush1.msra.mxu1 %v310_v41 }
  0x20   :  { %560 = vmatpush3.msra.mxu0 %v206_v19  ;;  %364 = vmatprep.subr.mxu1 %v309_v42 }
  0x21   :  { %561 = vmatprep.subr.mxu0 %v626_v3  ;;  %365 = vmatpush1.msra.mxu1 %v308_v43 }
  0x22   :  { %562 = vmatpush3.msra.mxu0 %v205_v20  ;;  %366 = vmatprep.subr.mxu1 %v307_v44 }
  0x23   :  { %563 = vmatprep.subr.mxu0 %v626_v3  ;;  %367 = vmatpush1.msra.mxu1 %v306_v45  ;;  %v334_v3 = vlaneseq }
  0x24   :  { %564 = vmatpush3.msra.mxu0 %v204_v21  ;;  %368 = vmatprep.subr.mxu1 %v305_v46 }
  0x25   :  { %369 = vmatpush1.msra.mxu1 %v304_v47  ;;  %v335_v4 = vshrl.u32 %v334_v3, 7 }
  0x26   :  { %370 = vmatprep.subr.mxu1 %v303_v48 }
  0x27   :  { %371 = vmatpush1.msra.mxu1 %v302_v57  ;;  %v336_v5 = vsub.s32 0, %v335_v4  ;;  %v340_v7 = vsub.s32 1, %v335_v4 }
  0x28   :  { %372 = vmatprep.subr.mxu1 %v301_v58 }
  0x29   :  { %373 = vmatpush1.msra.mxu1 %v300_v59  ;;  %v337_v8 = vrot.slane %v330_v6, %v336_v5  ;;  %v341_v9 = vrot.slane %v330_v6, %v340_v7 }
  0x2a   :  { %374 = vmatprep.subr.mxu1 %v299_v60 }
  0x2b   :  { %375 = vmatpush1.msra.mxu1 %v298_v61 }
  0xc3   :  { %v118_v49 = vpop.f32.mrf.mxu0 }
  0xc5   :  { %v525_v50 = vpop.f32.mrf.mxu0 }
  0xc6   :  { %v192_v52 = vpop.f32.mrf.mxu1 }
  0xc7   :  { %v193_v53 = vadd.f32 %v192_v52, %v118_v49 }
  0xc8   :  { %v532_v54 = vpop.f32.mrf.mxu1 }
  0xc9   :  { %v202_v55 = vadd.f32 %v495_v51, %v193_v53 }
  0xcb   :  { %v203_v56 = vmax.f32 %v202_v55, 0.0 }
  0xcd   :  { %566 = vmatmul.mubr.f32.vlgmr.msra.gmra.mxu0 %v203_v56 }
 0x18d   :  { %v293_v63 = vpop.f32.mrf.mxu0 }
 0x18e   :  { %v294_v0 = vadd.f32 %v496_v62, %v293_v63 }
 0x18f   :  { %v567_v1 = vpop.f32.mrf.mxu0 }
 0x190   :  { %v297_v2 = vmax.f32 %v294_v0, 0.0 }
 0x192   :  { %409 = vmatmul.mubr.f32.vlgmr.msra.gmra.mxu1 %v297_v2 }
 0x252   :  { %v410_v10 = vpop.f32.mrf.mxu1 }
 0x253   :  { %v411_v11 = vadd.f32 %v410_v10, %v337_v8 }
 0x254   :  { %v412_v13 = vpop.f32.mrf.mxu1 }
 0x255   :  { %461 = vst [vmem:[#allocation2] sm:$0xff] %v411_v11  ;;  %v413_v14 = vadd.f32 %v412_v13, %v341_v9 }
 0x256   :  { %593 = shalt.err (!%p590_p4)
}
 0x257   :  { %474 = dma.vmem_to_hbm [thread:$0]  %s472_s19, 128, %s889_s11, [#allocation3]   ;;  %v421_v15 = vsub.f32 %v497_v12, %v413_v14  ;;  %v498_v30 = vld [vmem:[%s888_s10] ss:$0 sm:$0xff] }
 0x258   :  { %s629_s10 = smov [#allocation4]  }
 0x259   :  { %v423_v16 = vand.u32 2147483647, %v421_v15  ;;  %v422_v27 = vmax.f32 %v421_v15, 0.0  ;;  %s481_s23 = sshll.u32 %s629_s10, 4  ;;  %s482_s23 = int_to_ptr.vmem [resolvable:$true] %s481_s23 }
 0x25a   :  { %s602_s24 = scalar_lea.vmem %s482_s23, 128  ;;  %p607_p6 = scmp.lt.s32.totalorder %s482_s23, %s482_s23 }
 0x25b   :  { %v424_v17 = vsub.f32 0.0, %v423_v16  ;;  %p603_p5 = scmp.ne.s32.totalorder %s482_s23, %s602_s24  ;;  %p608_p7 = scmp.lt.s32.totalorder %s602_s24, %s602_s24 }
 0x25d   :  { %v425_v18 = vmul.f32 1.442695, %v424_v17  ;;  %p609_p8 = por %p608_p7, %p607_p6 }
 0x25f   :  { %572 = vpow2.f32 %v425_v18  ;;  %p610_p9 = pnand %p609_p8, %p603_p5 }
 0x26c   :  { %v573_v19 = vpop.eup %572 }
 0x26d   :  { %v427_v20 = vadd.f32 1.0, %v573_v19  ;;  %v430_v21 = vmul.f32 -0.5, %v573_v19  ;;  %v433_v23 = vand.u32 2147483647, %v573_v19 }
 0x26f   :  { %574 = vlog2.f32 %v427_v20  ;;  %v431_v22 = vadd.f32 1.0, %v430_v21  ;;  %vm434_vm3 = vcmp.lt.f32.partialorder %v433_v23, 0.0004427343 }
 0x271   :  { %v432_v26 = vmul.f32 %v573_v19, %v431_v22 }
 0x27c   :  { %v575_v24 = vpop.eup %574 }
 0x27d   :  { %v429_v25 = vmul.f32 0.6931472, %v575_v24 }
 0x27f   :  { %v435_v28 = vsel %vm434_vm3, %v432_v26, %v429_v25 }
 0x280   :  { %v436_v29 = vadd.f32 %v435_v28, %v422_v27 }
 0x282   :  { %v437_v31 = vsub.f32 %v497_v12, %v436_v29 }
 0x284   :  { %v444_v32 = vsub.f32 %v437_v31, %v498_v30 }
 0x286   :  { %v446_v33 = vand.u32 2147483647, %v444_v32  ;;  %v445_v44 = vmax.f32 %v444_v32, 0.0 }
 0x288   :  { %v447_v34 = vsub.f32 0.0, %v446_v33 }
 0x28a   :  { %v448_v35 = vmul.f32 1.442695, %v447_v34 }
 0x28c   :  { %576 = vpow2.f32 %v448_v35 }
 0x299   :  { %v577_v36 = vpop.eup %576 }
 0x29a   :  { %v450_v37 = vadd.f32 1.0, %v577_v36  ;;  %v453_v38 = vmul.f32 -0.5, %v577_v36  ;;  %v456_v40 = vand.u32 2147483647, %v577_v36 }
 0x29c   :  { %578 = vlog2.f32 %v450_v37  ;;  %v454_v39 = vadd.f32 1.0, %v453_v38  ;;  %vm457_vm4 = vcmp.lt.f32.partialorder %v456_v40, 0.0004427343 }
 0x29e   :  { %v455_v43 = vmul.f32 %v577_v36, %v454_v39 }
 0x2a9   :  { %v579_v41 = vpop.eup %578 }
 0x2aa   :  { %v452_v42 = vmul.f32 0.6931472, %v579_v41 }
 0x2ac   :  { %v458_v45 = vsel %vm457_vm4, %v455_v43, %v452_v42 }
 0x2ad   :  { %v459_v46 = vadd.f32 %v458_v45, %v445_v44 }
 0x2af   :  { %v460_v47 = vadd.f32 %v498_v30, %v459_v46 }
 0x2b1   :  { %v462_v48 = vmul.f32 1.442695, %v460_v47 }
 0x2b3   :  { %580 = vpow2.f32 %v462_v48 }
 0x2c0   :  { %v581_v49 = vpop.eup %580 }
 0x2c1   :  { %464 = vst [vmem:[#allocation4] sm:$0xff] %v581_v49 }
 0x2c2   :  { %613 = shalt.err (!%p610_p9)
}
 0x2c3   :  { %484 = dma.vmem_to_hbm [thread:$0]  %s482_s23, 128, %s890_s12, [#allocation5]  }
 0x2c4   :  { %622 = dma.done.wait [#allocation3], 128  }
 0x2c5   :  { %623 = vsyncadd [#allocation3], 4294967168 }
 0x2c6   :  { %624 = dma.done.wait [#allocation5], 128  }
 0x2c7   :  { %625 = vsyncadd [#allocation5], 4294967168 }
 0x2c8   :  { %491 = vsyncpa [#allocation3], 1 }
 0x2c9   :  { %492 = vsyncpa [#allocation5], 1 }

</bundles_post_ra>
